<compile_context>
chip_gen: v7x
topology: tpu7x:2x2x1
jax: 0.10.0
libtpu: 0.0.40
codegen_flags: <defaults>
</compile_context>

<pallas_src>
import functools

import jax
import jax.numpy as jnp
from jax import lax
from jax.experimental import pallas as pl
from jax.experimental.pallas import tpu as pltpu

_LANES = 512                      # lane-dense last dim (multiple of 128)
_SMALL_INPUT_BYTES = 128 * 1024   # below this, skip Pallas entirely


def _sublane_multiple(itemsize):
    # Min second-minor granularity per dtype packing: 8 (32-bit), 16 (16-bit), 32 (8-bit).
    return max(8, 32 // max(int(itemsize), 1))


def _vmem_config():
    """(tile_bytes_per_buffer, vmem_limit_bytes), tuned per TPU generation."""
    # Safe everywhere (v7x has only 64 MiB physical VMEM): 4 MiB tiles,
    # 2 in + 2 out double-buffers = 16 MiB << 32 MiB scoped limit.
    tile_bytes, vmem_limit = 4 * 1024 * 1024, 32 * 1024 * 1024
    try:
        info = pltpu.get_tpu_info()
        if info.vmem_capacity_bytes >= 96 * 1024 * 1024:   # v5e/v6e: 128 MiB VMEM
            tile_bytes, vmem_limit = 8 * 1024 * 1024, 48 * 1024 * 1024
    except Exception:
        pass
    return tile_bytes, vmem_limit


def _add_epsilon_kernel(x_ref, o_ref, *, epsilon):
    # Pure elementwise add on the VPU; epsilon is a compile-time constant.
    o_ref[...] = x_ref[...] + jnp.asarray(epsilon, dtype=x_ref.dtype)


def _add_epsilon_2d(x2d, epsilon, tile_bytes, vmem_limit):
    """Run the kernel over a lane-dense (rows, 512) slab."""
    rows = x2d.shape[0]
    itemsize = x2d.dtype.itemsize
    sub = _sublane_multiple(itemsize)
    # Constant tile *bytes* across dtypes -> same grid-step count for f32/bf16/int8.
    tm = max(sub, (tile_bytes // (_LANES * itemsize)) // sub * sub)
    if rows <= tm:
        tm = rows  # single full-extent block (full-dim blocks need no divisibility)

    kernel = functools.partial(_add_epsilon_kernel, epsilon=epsilon)
    return pl.pallas_call(
        kernel,
        out_shape=jax.ShapeDtypeStruct(x2d.shape, x2d.dtype),
        # cdiv grid: ragged last row-block is masked by Pallas, no row padding.
        grid=(pl.cdiv(rows, tm),),
        in_specs=[pl.BlockSpec((tm, _LANES), lambda i: (i, 0))],
        out_specs=pl.BlockSpec((tm, _LANES), lambda i: (i, 0)),
        compiler_params=pltpu.CompilerParams(
            # "parallel" is harmless on 1-TC parts; CORE_PARALLEL on v7x only
            # helps if one TC's DMA engines can't saturate HBM (verify w/ trace).
            dimension_semantics=("parallel",),
            vmem_limit_bytes=vmem_limit,
        ),
    )(x2d)


def add_epsilon(x, epsilon=1e-10, *, min_pallas_bytes=_SMALL_INPUT_BYTES):
    """Equivalent of AddEpsilon.forward: returns x + epsilon (same shape/dtype)."""
    orig_shape = x.shape
    dtype = x.dtype
    n = x.size
    if n == 0:
        return x

    eps = jnp.asarray(epsilon, dtype=dtype)

    # Fast path: tiny tensors are cheaper as a fused XLA add than any pallas_call.
    if n * dtype.itemsize < min_pallas_bytes:
        return x + eps

    tile_bytes, vmem_limit = _vmem_config()
    flat = x.reshape(-1)
    n_main = (n // _LANES) * _LANES
    rem = n - n_main

    if rem == 0:
        # Copy-free reshape to a lane-dense slab.
        out2d = _add_epsilon_2d(flat.reshape(n // _LANES, _LANES),
                                epsilon, tile_bytes, vmem_limit)
        return out2d.reshape(orig_shape)

    if n_main == 0:
        return x + eps

    # Ragged size: Pallas on the 512-aligned prefix, tiny (<512 elem) tail in XLA.
    main2d = lax.slice(flat, (0,), (n_main,)).reshape(n_main // _LANES, _LANES)
    out_main = _add_epsilon_2d(main2d, epsilon, tile_bytes, vmem_limit).reshape(-1)
    tail_out = lax.slice(flat, (n_main,), (n,)) + eps
    return jnp.concatenate([out_main, tail_out]).reshape(orig_shape)


if __name__ == "__main__":
    key = jax.random.PRNGKey(0)
    # NCHW input consistent with the ResNet context: batch=2, channels=4, spatial=16
    x = jax.random.normal(key, (2, 4, 16, 16), dtype=jnp.float32)

    eps = 1e-10
    # Force the Pallas path (default fast path would bypass it for this 8 KiB input).
    y = add_epsilon(x, epsilon=eps, min_pallas_bytes=0)
    y = jax.block_until_ready(y)

    # Correctness check against plain JAX reference.
    ref = x + jnp.float32(eps)
    assert y.shape == x.shape and y.dtype == x.dtype
    assert jnp.allclose(y, ref), "mismatch vs reference"

    # Also exercise the default small-input fast path.
    y_fast = jax.block_until_ready(add_epsilon(x, epsilon=eps))
    assert jnp.allclose(y_fast, ref), "fast-path mismatch vs reference"

    print("KERNEL_OK")
</pallas_src>

<mosaic_0001>
module attributes {stable_mosaic.version = 11 : i64} {
  func.func @_add_epsilon_kernel(%arg0: i32, %arg1: memref<4x512xf32, #tpu.memory_space<vmem>>, %arg2: memref<4x512xf32, #tpu.memory_space<vmem>>) attributes {dimension_semantics = [#tpu.dimension_semantics<parallel>], iteration_bounds = array<i64: 1>, scalar_prefetch = 0 : i64, scratch_operands = 0 : i64, tpu.core_type = #tpu.core_type<tc>, window_params = [{transform_indices = @transform_0, window_bounds = array<i64: 4, 512>}, {transform_indices = @transform_1, window_bounds = array<i64: 4, 512>}]} {
    %c0 = arith.constant 0 : index
    %c0_0 = arith.constant 0 : index
    %0 = vector.load %arg1[%c0, %c0_0] : memref<4x512xf32, #tpu.memory_space<vmem>>, vector<4x512xf32>
    %cst = arith.constant 1.000000e-10 : f32
    %1 = vector.broadcast %cst : f32 to vector<4x512xf32>
    %2 = arith.addf %0, %1 : vector<4x512xf32>
    %c0_1 = arith.constant 0 : index
    %c0_2 = arith.constant 0 : index
    %3 = vector.load %arg2[%c0_1, %c0_2] : memref<4x512xf32, #tpu.memory_space<vmem>>, vector<4x512xf32>
    tpu.vector_store %arg2[%c0_1, %c0_2], %2 {strides = array<i32>} : memref<4x512xf32, #tpu.memory_space<vmem>>, vector<4x512xf32>,
    return
  }
  func.func @transform_0(%arg0: i32) -> (i32, i32) {
    %c0_i32 = arith.constant 0 : i32
    %c0_i32_0 = arith.constant 0 : i32
    return %arg0, %c0_i32 : i32, i32
  }
  func.func @transform_1(%arg0: i32) -> (i32, i32) {
    %c0_i32 = arith.constant 0 : i32
    %c0_i32_0 = arith.constant 0 : i32
    return %arg0, %c0_i32 : i32, i32
  }
}

</mosaic_0001>

<bundles_post_ra>
// kernel: tpu_custom_call.1
= control target key start
LH: loop header
LB: loop body
LE: loop exit
PB: predicated region body
PF: predicated region fallthrough
CT: control target
= control target key end

     0   :  { %6 = vsyncpa [#allocation3], 0  ;;  %s128_s0 = inlined_call_operand.hbm [shape: f32[4,512], index: 0, kind: input, shape index: {}]   ;;  %s129_s1 = inlined_call_operand.hbm [shape: f32[4,512], index: 1, kind: output, shape index: {}]  }
   0x1   :  { %7 = vsyncpa [#allocation4], 0  ;;  %s92_s6 = smov [#allocation2]   ;;  %s44_s10 = scalar_lea.hbm %s128_s0, 256 }
   0x2   :  { %s14_s7 = sshll.u32 %s92_s6, 4  ;;  %p45_p0 = scmp.ne.s32.totalorder %s128_s0, %s44_s10  ;;  %s15_s7 = int_to_ptr.vmem [resolvable:$true] %s14_s7 }
   0x3   :  { %p48_p1 = scmp.lt.u32.totalorder %s44_s10, %s128_s0 }
   0x5   :  { %p50_p2 = pnand %p48_p1, %p45_p0 }
   0x7   :  { %53 = shalt.err (!%p50_p2)
}
   0x8   :  { %s54_s15 = scalar_lea.vmem %s15_s7, 256  ;;  %p59_p4 = scmp.lt.s32.totalorder %s15_s7, %s15_s7 }
   0x9   :  { %p55_p3 = scmp.ne.s32.totalorder %s15_s7, %s54_s15  ;;  %p60_p5 = scmp.lt.s32.totalorder %s54_s15, %s54_s15 }
   0xb   :  { %p61_p6 = por %p60_p5, %p59_p4 }
   0xd   :  { %p62_p7 = pnand %p61_p6, %p55_p3 }
   0xf   :  { %65 = shalt.err (!%p62_p7)
}
  0x10   :  { %17 = dma.hbm_to_vmem [thread:$0]  %s128_s0, 256, %s15_s7, [#allocation3]  }
  0x11   :  { %88 = dma.done.wait [#allocation3], 256  }
  0x12   :  { %89 = vsyncadd [#allocation3], 4294967040  ;;  %s93_s18 = smov [#allocation5]   ;;  %v21_v0 = vld [vmem:[#allocation2] sm:$0xff]  ;;  %v22_v1 = vld [vmem:[#allocation2 + $0x8] sm:$0xff] }
  0x13   :  { %s33_s19 = sshll.u32 %s93_s18, 4  ;;  %v23_v2 = vadd.f32 1e-10, %v21_v0  ;;  %v24_v3 = vadd.f32 1e-10, %v22_v1  ;;  %s34_s19 = int_to_ptr.vmem [resolvable:$true] %s33_s19 }
  0x14   :  { %s66_s20 = scalar_lea.vmem %s34_s19, 256  ;;  %p71_p9 = scmp.lt.s32.totalorder %s34_s19, %s34_s19 }
  0x15   :  { %25 = vst [vmem:[#allocation5] sm:$0xff] %v23_v2  ;;  %26 = vst [vmem:[#allocation5 + $0x8] sm:$0xff] %v24_v3  ;;  %p67_p8 = scmp.ne.s32.totalorder %s34_s19, %s66_s20  ;;  %p72_p10 = scmp.lt.s32.totalorder %s66_s20, %s66_s20 }
  0x17   :  { %p73_p11 = por %p72_p10, %p71_p9 }
  0x19   :  { %p74_p12 = pnand %p73_p11, %p67_p8 }
  0x1b   :  { %77 = shalt.err (!%p74_p12)
}
  0x1c   :  { %s78_s22 = scalar_lea.hbm %s129_s1, 256 }
  0x1d   :  { %p79_p13 = scmp.ne.s32.totalorder %s129_s1, %s78_s22  ;;  %p82_p0 = scmp.lt.u32.totalorder %s78_s22, %s129_s1 }
  0x1f   :  { %p84_p1 = pnand %p82_p0, %p79_p13 }
  0x21   :  { %87 = shalt.err (!%p84_p1)
}
  0x22   :  { %36 = dma.vmem_to_hbm [thread:$0]  %s34_s19, 256, %s129_s1, [#allocation4]  }
  0x23   :  { %90 = dma.done.wait [#allocation4], 256  }
  0x24   :  { %91 = vsyncadd [#allocation4], 4294967040 }
  0x25   :  { %40 = vsyncpa [#allocation3], 1 }
  0x26   :  { %41 = vsyncpa [#allocation4], 1 }

</bundles_post_ra>
